<compile_context>
chip_gen: v6e
topology: v6e:2x2x1
jax: 0.10.0
libtpu: 0.0.40
codegen_flags: <defaults>
</compile_context>

<pallas_src>
import jax
import jax.numpy as jnp
from jax.experimental import pallas as pl
from jax.experimental.pallas import tpu as pltpu

IN_FEATURES = 30 * 30 * 3   # 2700
HIDDEN = 128
OUT_FEATURES = 5
OUT_PAD = 128               # lane-dense padded output width


def _mlp_kernel(x_ref, w1_ref, b1_ref, w2_ref, b2_ref, o_ref):
    # x_ref:  (TB, 2700) bf16      w1_ref: (2700, 128) bf16   b1_ref: (1, 128) f32
    # w2_ref: (128, 128) bf16      b2_ref: (1, 128) f32       o_ref:  (TB, 128) f32
    x = x_ref[...]
    h = jnp.dot(x, w1_ref[...], preferred_element_type=jnp.float32)
    h = jnp.maximum(h + b1_ref[...], 0.0)            # bias + ReLU in f32
    h = h.astype(w2_ref.dtype)                       # bf16 into the 2nd MXU pass
    y = jnp.dot(h, w2_ref[...], preferred_element_type=jnp.float32)
    o_ref[...] = (y + b2_ref[...]).astype(o_ref.dtype)


def nn_forward(x_nchw, w1, b1, w2, b2):
    """Forward pass equivalent to the PyTorch NN module.

    x_nchw: (B, 3, 30, 30) float32
    w1: (2700, 128) bf16, b1: (128,) f32, w2: (128, 5) bf16, b2: (5,) f32
    returns: (B, 5) float32
    """
    B = x_nchw.shape[0]
    # Contiguous NCHW reshape == torch x.view(B, -1); no extra relayout copy.
    x_flat = x_nchw.reshape(B, -1).astype(jnp.bfloat16)

    # Batch tile: 256 rows (multiple of 128/256 MXU rows) when B is large,
    # otherwise a single full-batch tile (block dim == array dim is legal).
    TB = 256 if B >= 256 else B
    Bp = pl.cdiv(B, TB) * TB
    if Bp != B:
        x_flat = jnp.pad(x_flat, ((0, Bp - B), (0, 0)))

    # Lane-dense padded second layer: 5 -> 128 columns (zero padding).
    w2p = jnp.zeros((HIDDEN, OUT_PAD), w2.dtype).at[:, :OUT_FEATURES].set(w2)
    b2p = jnp.zeros((1, OUT_PAD), jnp.float32).at[0, :OUT_FEATURES].set(
        b2.astype(jnp.float32))
    b1_2d = b1.reshape(1, HIDDEN).astype(jnp.float32)

    bytes_accessed = (
        x_flat.size * x_flat.dtype.itemsize
        + w1.size * w1.dtype.itemsize
        + w2p.size * w2p.dtype.itemsize
        + b1_2d.size * 4 + b2p.size * 4
        + Bp * OUT_PAD * 4)
    cost = pl.CostEstimate(
        flops=2 * Bp * IN_FEATURES * HIDDEN + 2 * Bp * HIDDEN * OUT_PAD,
        transcendentals=0,
        bytes_accessed=bytes_accessed)

    out = pl.pallas_call(
        _mlp_kernel,
        out_shape=jax.ShapeDtypeStruct((Bp, OUT_PAD), jnp.float32),
        grid_spec=pltpu.PrefetchScalarGridSpec(
            num_scalar_prefetch=0,
            grid=(Bp // TB,),
            in_specs=[
                pl.BlockSpec((TB, IN_FEATURES), lambda i: (i, 0)),       # x tile
                pl.BlockSpec((IN_FEATURES, HIDDEN), lambda i: (0, 0)),   # w1 resident
                pl.BlockSpec((1, HIDDEN), lambda i: (0, 0)),             # b1 resident
                pl.BlockSpec((HIDDEN, OUT_PAD), lambda i: (0, 0)),       # w2 resident
                pl.BlockSpec((1, OUT_PAD), lambda i: (0, 0)),            # b2 resident
            ],
            out_specs=pl.BlockSpec((TB, OUT_PAD), lambda i: (i, 0)),
        ),
        compiler_params=pltpu.CompilerParams(
            dimension_semantics=("parallel",)),
        cost_estimate=cost,
    )(x_flat, w1, b1_2d, w2p, b2p)

    return out[:B, :OUT_FEATURES]


def init_params(key):
    """Deterministic init mimicking torch.nn.Linear defaults
    (uniform(-1/sqrt(fan_in), 1/sqrt(fan_in))). Weights stored as bf16
    (in, out) so the kernel does x @ w == torch x @ W.T."""
    k1, k2, k3, k4 = jax.random.split(key, 4)
    bound1 = 1.0 / (IN_FEATURES ** 0.5)
    bound2 = 1.0 / (HIDDEN ** 0.5)
    w1 = jax.random.uniform(k1, (IN_FEATURES, HIDDEN), jnp.float32,
                            minval=-bound1, maxval=bound1).astype(jnp.bfloat16)
    b1 = jax.random.uniform(k2, (HIDDEN,), jnp.float32,
                            minval=-bound1, maxval=bound1)
    w2 = jax.random.uniform(k3, (HIDDEN, OUT_FEATURES), jnp.float32,
                            minval=-bound2, maxval=bound2).astype(jnp.bfloat16)
    b2 = jax.random.uniform(k4, (OUT_FEATURES,), jnp.float32,
                            minval=-bound2, maxval=bound2)
    return w1, b1, w2, b2


if __name__ == "__main__":
    key = jax.random.PRNGKey(0)
    k_params, k_x1, k_x2 = jax.random.split(key, 3)

    w1, b1, w2, b2 = init_params(k_params)
    w1_f32 = w1.astype(jnp.float32)
    w2_f32 = w2.astype(jnp.float32)

    def ref_f32(x):
        xf = x.reshape(x.shape[0], -1)
        h = jnp.maximum(xf @ w1_f32 + b1, 0.0)
        return h @ w2_f32 + b2

    def ref_bf16(x):
        # Same bf16-input / f32-accumulate recipe as the kernel.
        xf = x.reshape(x.shape[0], -1).astype(jnp.bfloat16)
        h = jnp.dot(xf, w1, preferred_element_type=jnp.float32) + b1
        h = jnp.maximum(h, 0.0).astype(jnp.bfloat16)
        return jnp.dot(h, w2, preferred_element_type=jnp.float32) + b2

    # Small batch (single-tile path).
    B_small = 2
    x_small = jax.random.normal(k_x1, (B_small, 3, 30, 30), jnp.float32)
    out_small = jax.block_until_ready(nn_forward(x_small, w1, b1, w2, b2))
    assert out_small.shape == (B_small, OUT_FEATURES)
    assert jnp.allclose(out_small, ref_bf16(x_small), atol=2e-3, rtol=2e-3)
    assert jnp.allclose(out_small, ref_f32(x_small), atol=5e-2, rtol=5e-2)

    # Larger batch exercising the tiled (grid > 1) pipelined path.
    B_big = 512
    x_big = jax.random.normal(k_x2, (B_big, 3, 30, 30), jnp.float32)
    out_big = jax.block_until_ready(nn_forward(x_big, w1, b1, w2, b2))
    assert out_big.shape == (B_big, OUT_FEATURES)
    assert jnp.allclose(out_big, ref_bf16(x_big), atol=2e-3, rtol=2e-3)
    assert jnp.allclose(out_big, ref_f32(x_big), atol=5e-2, rtol=5e-2)

    print("KERNEL_OK")
</pallas_src>

<mosaic_0001>
module attributes {stable_mosaic.version = 11 : i64} {
  func.func @_mlp_kernel(%arg0: i32, %arg1: memref<2x2700xbf16, #tpu.memory_space<vmem>>, %arg2: memref<2700x128xbf16, #tpu.memory_space<vmem>>, %arg3: memref<1x128xf32, #tpu.memory_space<vmem>>, %arg4: memref<128x128xbf16, #tpu.memory_space<vmem>>, %arg5: memref<1x128xf32, #tpu.memory_space<vmem>>, %arg6: memref<2x128xf32, #tpu.memory_space<vmem>>) attributes {dimension_semantics = [#tpu.dimension_semantics<parallel>], iteration_bounds = array<i64: 1>, scalar_prefetch = 0 : i64, scratch_operands = 0 : i64, tpu.core_type = #tpu.core_type<tc>, window_params = [{transform_indices = @transform_0, window_bounds = array<i64: 2, 2700>}, {pipeline_mode = #tpu.pipeline_mode<synchronous>, transform_indices = @transform_1, window_bounds = array<i64: 2700, 128>}, {pipeline_mode = #tpu.pipeline_mode<synchronous>, transform_indices = @transform_2, window_bounds = array<i64: 1, 128>}, {pipeline_mode = #tpu.pipeline_mode<synchronous>, transform_indices = @transform_3, window_bounds = array<i64: 128, 128>}, {pipeline_mode = #tpu.pipeline_mode<synchronous>, transform_indices = @transform_4, window_bounds = array<i64: 1, 128>}, {transform_indices = @transform_5, window_bounds = array<i64: 2, 128>}]} {
    %c0 = arith.constant 0 : index
    %c0_0 = arith.constant 0 : index
    %0 = vector.load %arg1[%c0, %c0_0] : memref<2x2700xbf16, #tpu.memory_space<vmem>>, vector<2x2700xbf16>
    %c0_1 = arith.constant 0 : index
    %c0_2 = arith.constant 0 : index
    %1 = vector.load %arg2[%c0_1, %c0_2] : memref<2700x128xbf16, #tpu.memory_space<vmem>>, vector<2700x128xbf16>
    %cst = arith.constant dense<0.000000e+00> : vector<2x128xf32>
    %2 = tpu.matmul %0, %1, %cst {dimension_numbers = #tpu.dot_dimension_numbers<[1], [0], [0], [1], [0, 0, 1, 1], [], []>} : vector<2x2700xbf16>, vector<2700x128xbf16>, vector<2x128xf32> -> vector<2x128xf32>
    %c0_3 = arith.constant 0 : index
    %c0_4 = arith.constant 0 : index
    %3 = vector.load %arg3[%c0_3, %c0_4] : memref<1x128xf32, #tpu.memory_space<vmem>>, vector<1x128xf32>
    %4 = vector.broadcast %3 : vector<1x128xf32> to vector<2x128xf32>
    %5 = arith.addf %2, %4 : vector<2x128xf32>
    %cst_5 = arith.constant 0.000000e+00 : f32
    %6 = vector.broadcast %cst_5 : f32 to vector<2x128xf32>
    %7 = arith.maximumf %5, %6 : vector<2x128xf32>
    %8 = arith.truncf %7 : vector<2x128xf32> to vector<2x128xbf16>
    %c0_6 = arith.constant 0 : index
    %c0_7 = arith.constant 0 : index
    %9 = vector.load %arg4[%c0_6, %c0_7] : memref<128x128xbf16, #tpu.memory_space<vmem>>, vector<128x128xbf16>
    %cst_8 = arith.constant dense<0.000000e+00> : vector<2x128xf32>
    %10 = tpu.matmul %8, %9, %cst_8 {dimension_numbers = #tpu.dot_dimension_numbers<[1], [0], [0], [1], [0, 0, 1, 1], [], []>} : vector<2x128xbf16>, vector<128x128xbf16>, vector<2x128xf32> -> vector<2x128xf32>
    %c0_9 = arith.constant 0 : index
    %c0_10 = arith.constant 0 : index
    %11 = vector.load %arg5[%c0_9, %c0_10] : memref<1x128xf32, #tpu.memory_space<vmem>>, vector<1x128xf32>
    %12 = vector.broadcast %11 : vector<1x128xf32> to vector<2x128xf32>
    %13 = arith.addf %10, %12 : vector<2x128xf32>
    %c0_11 = arith.constant 0 : index
    %c0_12 = arith.constant 0 : index
    %14 = vector.load %arg6[%c0_11, %c0_12] : memref<2x128xf32, #tpu.memory_space<vmem>>, vector<2x128xf32>
    tpu.vector_store %arg6[%c0_11, %c0_12], %13 {strides = array<i32>} : memref<2x128xf32, #tpu.memory_space<vmem>>, vector<2x128xf32>,
    return
  }
  func.func @transform_0(%arg0: i32) -> (i32, i32) {
    %c0_i32 = arith.constant 0 : i32
    %c0_i32_0 = arith.constant 0 : i32
    return %arg0, %c0_i32 : i32, i32
  }
  func.func @transform_1(%arg0: i32) -> (i32, i32) {
    %c0_i32 = arith.constant 0 : i32
    %c0_i32_0 = arith.constant 0 : i32
    %c0_i32_1 = arith.constant 0 : i32
    return %c0_i32, %c0_i32_0 : i32, i32
  }
  func.func @transform_2(%arg0: i32) -> (i32, i32) {
    %c0_i32 = arith.constant 0 : i32
    %c0_i32_0 = arith.constant 0 : i32
    %c0_i32_1 = arith.constant 0 : i32
    return %c0_i32, %c0_i32_0 : i32, i32
  }
  func.func @transform_3(%arg0: i32) -> (i32, i32) {
    %c0_i32 = arith.constant 0 : i32
    %c0_i32_0 = arith.constant 0 : i32
    %c0_i32_1 = arith.constant 0 : i32
    return %c0_i32, %c0_i32_0 : i32, i32
  }
  func.func @transform_4(%arg0: i32) -> (i32, i32) {
    %c0_i32 = arith.constant 0 : i32
    %c0_i32_0 = arith.constant 0 : i32
    %c0_i32_1 = arith.constant 0 : i32
    return %c0_i32, %c0_i32_0 : i32, i32
  }
  func.func @transform_5(%arg0: i32) -> (i32, i32) {
    %c0_i32 = arith.constant 0 : i32
    %c0_i32_0 = arith.constant 0 : i32
    return %arg0, %c0_i32 : i32, i32
  }
}

</mosaic_0001>

<bundles_post_ra>
// kernel: tpu_custom_call.1
= control target key start
LH: loop header
LB: loop body
LE: loop exit
PB: predicated region body
PF: predicated region fallthrough
CT: control target
= control target key end

     0   :  { %10 = vsyncpa [#allocation3], 0  ;;  %s2962_s0 = inlined_call_operand.hbm [shape: bf16[2,2700], index: 0, kind: input, shape index: {}]   ;;  %s2963_s1 = inlined_call_operand.hbm [shape: bf16[2700,128], index: 1, kind: input, shape index: {}]   ;;  %s2964_s2 = inlined_call_operand.vmem [shape: f32[1,128], index: 2, kind: input, shape index: {}]   ;;  %s2965_s3 = inlined_call_operand.hbm [shape: bf16[128,128], index: 3, kind: input, shape index: {}]   ;;  %s2966_s4 = inlined_call_operand.vmem [shape: f32[1,128], index: 4, kind: input, shape index: {}]   ;;  %s2967_s5 = inlined_call_operand.hbm [shape: f32[2,128], index: 5, kind: output, shape index: {}]  }
   0x1   :  { %11 = vsyncpa [#allocation6], 0 }
   0x2   :  { %12 = vsyncpa [#allocation4], 0  ;;  %s2874_s18 = smov [#allocation5]  }
   0x3   :  { %s28_s19 = sshll.u32 %s2874_s18, 4  ;;  %s29_s19 = int_to_ptr.vmem [resolvable:$true] %s28_s19 }
   0x4   :  { %s2796_s20 = scalar_lea.vmem %s29_s19, 21632  ;;  %p2801_p1 = scmp.lt.s32.totalorder %s29_s19, %s29_s19 }
   0x5   :  { %p2797_p0 = scmp.ne.s32.totalorder %s29_s19, %s2796_s20  ;;  %p2802_p2 = scmp.lt.s32.totalorder %s2796_s20, %s2796_s20 }
   0x7   :  { %p2803_p3 = por %p2802_p2, %p2801_p1 }
   0x9   :  { %p2804_p4 = pnand %p2803_p3, %p2797_p0 }
   0xb   :  { %2807 = shalt.err (!%p2804_p4)
}
   0xc   :  { %s2875_s21 = smov 64   ;;  %s2876_s22 = smov 4  }
   0xd   :  { %34 = dma.hbm_to_vmem [thread:$0]  %s2963_s1, 21632, %s29_s19, [#allocation6], %s2875_s21, %s2875_s21, %s2876_s22  }
   0xe   :  { %s2877_s25 = smov [#allocation2]   ;;  %s2878_s27 = smov [#allocation7]  }
   0xf   :  { %s19_s26 = sshll.u32 %s2877_s25, 4  ;;  %s42_s28 = sshll.u32 %s2878_s27, 4  ;;  %s20_s26 = int_to_ptr.vmem [resolvable:$true] %s19_s26  ;;  %s43_s28 = int_to_ptr.vmem [resolvable:$true] %s42_s28 }
  0x10   :  { %s2816_s29 = scalar_lea.vmem %s20_s26, 352  ;;  %p2821_p6 = scmp.lt.s32.totalorder %s20_s26, %s20_s26 }
  0x11   :  { %p2817_p5 = scmp.ne.s32.totalorder %s20_s26, %s2816_s29  ;;  %p2822_p7 = scmp.lt.s32.totalorder %s2816_s29, %s2816_s29 }
  0x13   :  { %p2823_p8 = por %p2822_p7, %p2821_p6 }
  0x15   :  { %p2824_p9 = pnand %p2823_p8, %p2817_p5 }
  0x17   :  { %2827 = shalt.err (!%p2824_p9)
}
  0x18   :  { %22 = dma.hbm_to_vmem [thread:$0]  %s2962_s0, 352, %s20_s26, [#allocation3]  }
  0x19   :  { %s2836_s7 = scalar_lea.vmem %s43_s28, 1024  ;;  %p2841_p11 = scmp.lt.s32.totalorder %s43_s28, %s43_s28 }
  0x1a   :  { %p2837_p10 = scmp.ne.s32.totalorder %s43_s28, %s2836_s7  ;;  %p2842_p12 = scmp.lt.s32.totalorder %s2836_s7, %s2836_s7 }
  0x1c   :  { %p2843_p13 = por %p2842_p12, %p2841_p11 }
  0x1e   :  { %p2844_p0 = pnand %p2843_p13, %p2837_p10 }
  0x20   :  { %2847 = shalt.err (!%p2844_p0)
}
  0x21   :  { %48 = dma.hbm_to_vmem [thread:$0]  %s2965_s3, 1024, %s43_s28, [#allocation6], %s2875_s21, %s2875_s21, %s2876_s22  }
  0x22   :  { %2868 = dma.done.wait [#allocation3], 352  }
  0x23   :  { %2869 = vsyncadd [#allocation3], 4294966944 }
  0x24   :  { %2870 = dma.done.wait [#allocation6], 22656  }
  0x25   :  { %2871 = vsyncadd [#allocation6], 4294944640  ;;  %v2608_v0 = vld [vmem:[#allocation5 + $0x78] sm:$0xff]   ;;  %v2612_v4 = vld [vmem:[#allocation5 + $0x70] sm:$0xff]   ;;  %v2879_v21 = vmov 1966171168   ;;  %v416_v23 = vlaneseq }
  0x26   :  { %v2609_v1 = vld [vmem:[#allocation5 + $0x38] sm:$0xff]   ;;  %2349 = vmatprep.subr.bf16.mxu0 %v2608_v0  ;;  %v2613_v5 = vld [vmem:[#allocation5 + $0x30] sm:$0xff]   ;;  %v2616_v8 = vld [vmem:[#allocation5 + $0x68] sm:$0xff]   ;;  %v414_v22 = vunpack.c.l.s4 %v2879_v21  ;;  %vm1591_vm0 = vcmask 97280   ;;  %vm1595_vm1 = vcmask 1045504   ;;  %vm2882_vm2 = vmmov 0  }
  0x27   :  { %v2610_v2 = vld [vmem:[#allocation5 + $0xf8] sm:$0xff]   ;;  %2350 = vmatpush3.bf16.msra.mxu0 %v2609_v1  ;;  %v2614_v6 = vld [vmem:[#allocation5 + $0xf0] sm:$0xff]   ;;  %v2617_v9 = vld [vmem:[#allocation5 + $0x28] sm:$0xff]   ;;  %v417_v29 = vshrl.u32 %v416_v23, 7  ;;  %s2883_s10 = smov [#allocation8]  }
  0x28   :  { %v2611_v3 = vld [vmem:[#allocation5 + $0xb8] sm:$0xff]   ;;  %2371 = vmatprep.subr.bf16.mxu1 %v2610_v2  ;;  %2351 = vmatprep.subr.bf16.mxu0 %v2612_v4  ;;  %v2615_v7 = vld [vmem:[#allocation5 + $0xb0] sm:$0xff]   ;;  %v2618_v10 = vld [vmem:[#allocation5 + $0xe8] sm:$0xff]   ;;  %v415_v28 = vunpack.c.0.s8 %v414_v22  ;;  %s2159_s11 = sshll.u32 %s2883_s10, 4  ;;  %s2160_s11 = int_to_ptr.vmem [resolvable:$true] %s2159_s11 }
  0x29   :  { %2372 = vmatpush3.bf16.msra.mxu1 %v2611_v3  ;;  %v2619_v11 = vld [vmem:[#allocation5 + $0xa8] sm:$0xff]   ;;  %v2620_v12 = vld [vmem:[#allocation5 + $0x60] sm:$0xff]   ;;  %v2624_v16 = vld [vmem:[#allocation5 + $0x58] sm:$0xff]   ;;  %s2848_s12 = scalar_lea.vmem %s2160_s11, 32  ;;  %p2853_p2 = scmp.lt.s32.totalorder %s2160_s11, %s2160_s11 }
  0x2a   :  { %2373 = vmatprep.subr.bf16.mxu1 %v2614_v6  ;;  %v2621_v13 = vld [vmem:[#allocation5 + $0x20] sm:$0xff]   ;;  %v2625_v17 = vld [vmem:[#allocation5 + $0x18] sm:$0xff]   ;;  %v2628_v20 = vld [vmem:[#allocation5 + $0x50] sm:$0xff]   ;;  %v2923_v34 = vsub.s32 %v415_v28, %v417_v29  ;;  %p2849_p1 = scmp.ne.s32.totalorder %s2160_s11, %s2848_s12  ;;  %p2854_p3 = scmp.lt.s32.totalorder %s2848_s12, %s2848_s12 }
  0x2b   :  { %2352 = vmatpush3.bf16.msra.mxu0 %v2613_v5  ;;  %v2622_v14 = vld [vmem:[#allocation5 + $0xe0] sm:$0xff]   ;;  %v2626_v18 = vld [vmem:[#allocation5 + $0xd8] sm:$0xff]   ;;  %v2629_v24 = vld [vmem:[#allocation5 + $0x10] sm:$0xff]  }
  0x2c   :  { %2353 = vmatprep.subr.bf16.mxu0 %v2616_v8  ;;  %v2623_v15 = vld [vmem:[#allocation5 + $0xa0] sm:$0xff]   ;;  %v2627_v19 = vld [vmem:[#allocation5 + $0x98] sm:$0xff]   ;;  %v2630_v25 = vld [vmem:[#allocation5 + $0xd0] sm:$0xff]   ;;  %p2855_p4 = por %p2854_p3, %p2853_p2 }
  0x2d   :  { %2374 = vmatpush3.bf16.msra.mxu1 %v2615_v7  ;;  %v2631_v26 = vld [vmem:[#allocation5 + $0x90] sm:$0xff]   ;;  %v2632_v27 = vld [vmem:[#allocation5 + $0x48] sm:$0xff]   ;;  %v2636_v33 = vld [vmem:[#allocation5 + $0x40] sm:$0xff]  }
  0x2e   :  { %2375 = vmatprep.subr.bf16.mxu1 %v2618_v10  ;;  %v2633_v30 = vld [vmem:[#allocation5 + $0x8] sm:$0xff]   ;;  %v2637_v35 = vld [vmem:[#allocation5] sm:$0xff]   ;;  %v2641_v41 = vld [vmem:[#allocation5 + $0x178] sm:$0xff]   ;;  %p2856_p5 = pnand %p2855_p4, %p2849_p1 }
  0x2f   :  { %2354 = vmatpush3.bf16.msra.mxu0 %v2617_v9  ;;  %v2634_v31 = vld [vmem:[#allocation5 + $0xc8] sm:$0xff]   ;;  %v2638_v36 = vld [vmem:[#allocation5 + $0xc0] sm:$0xff]   ;;  %v2643_v45 = vld [vmem:[#allocation5 + $0x1f8] sm:$0xff]  }
  0x30   :  { %2355 = vmatprep.subr.bf16.mxu0 %v2620_v12  ;;  %v2635_v32 = vld [vmem:[#allocation5 + $0x88] sm:$0xff]   ;;  %v2640_v40 = vld [vmem:[#allocation5 + $0x80] sm:$0xff]   ;;  %v2642_v47 = vld [vmem:[#allocation5 + $0x138] sm:$0xff]  }
  0x31   :  { %2376 = vmatpush3.bf16.msra.mxu1 %v2619_v11  ;;  %v61_v37 = vld [vmem:[#allocation2] sm:$0xff]  ;;  %v2644_v52 = vld [vmem:[#allocation5 + $0x1b8] sm:$0xff]   ;;  %v2653_v61 = vld [vmem:[#allocation5 + $0x160] sm:$0xff]  }
  0x32   :  { %2377 = vmatprep.subr.bf16.mxu1 %v2622_v14  ;;  %v412_v38 = vcombine.high %v61_v37, %v61_v37  ;;  %v419_v39 = vrot.slane %v61_v37, %v2923_v34  ;;  %v2645_v50 = vld [vmem:[#allocation5 + $0x170] sm:$0xff]   ;;  %v2649_v57 = vld [vmem:[#allocation5 + $0x168] sm:$0xff]   ;;  %v2655_v63 = vld [vmem:[#allocation5 + $0x1e0] sm:$0xff]  }
  0x33   :  { %2356 = vmatpush3.bf16.msra.mxu0 %v2621_v13  ;;  %v2647_v54 = vld [vmem:[#allocation5 + $0x1f0] sm:$0xff]   ;;  %v2651_v59 = vld [vmem:[#allocation5 + $0x1e8] sm:$0xff]   ;;  %v2654_v0 = vld [vmem:[#allocation5 + $0x120] sm:$0xff]  }
  0x34   :  { %2357 = vmatprep.subr.bf16.mxu0 %v2624_v16  ;;  %v427_v42 = vcombine.high %v419_v39, %v419_v39  ;;  %v435_v43 = vrot.slane %v419_v39, %v2923_v34  ;;  %v2928_v44 = vrot.slane %v412_v38, %v2923_v34  ;;  %v2646_v55 = vld [vmem:[#allocation5 + $0x130] sm:$0xff]   ;;  %v2650_v60 = vld [vmem:[#allocation5 + $0x128] sm:$0xff]   ;;  %v2657_v1 = vld [vmem:[#allocation5 + $0x158] sm:$0xff]  }
  0x35   :  { %2378 = vmatpush3.bf16.msra.mxu1 %v2623_v15  ;;  %v2648_v58 = vld [vmem:[#allocation5 + $0x1b0] sm:$0xff]   ;;  %v2652_v62 = vld [vmem:[#allocation5 + $0x1a8] sm:$0xff]   ;;  %v2656_v2 = vld [vmem:[#allocation5 + $0x1a0] sm:$0xff]  }
  0x36   :  { %2379 = vmatprep.subr.bf16.mxu1 %v2626_v18  ;;  %v449_v46 = vrot.slane %v427_v42, %v2923_v34  ;;  %v428_v48 = vcombine.high %v2928_v44, %v2928_v44  ;;  %v457_v49 = vcombine.high %v435_v43, %v435_v43  ;;  %v2659_v3 = vld [vmem:[#allocation5 + $0x1d8] sm:$0xff]   ;;  %v2661_v5 = vld [vmem:[#allocation5 + $0x150] sm:$0xff]   ;;  %v2665_v9 = vld [vmem:[#allocation5 + $0x148] sm:$0xff]  }
  0x37   :  { %2358 = vmatpush3.bf16.msra.mxu0 %v2625_v17  ;;  %v2658_v4 = vld [vmem:[#allocation5 + $0x118] sm:$0xff]   ;;  %v2663_v7 = vld [vmem:[#allocation5 + $0x1d0] sm:$0xff]   ;;  %v2667_v11 = vld [vmem:[#allocation5 + $0x1c8] sm:$0xff]   ;;  %v442_v17 = vrot.slane %v2928_v44, %v2923_v34 }
  0x38   :  { %2359 = vmatprep.subr.bf16.mxu0 %v2628_v20  ;;  %1631 = vmatprep.mubr.bf16.mxu0 %v449_v46  ;;  %v459_v51 = vcombine.high %v449_v46, %v449_v46  ;;  %v456_v53 = vrot.slane %v428_v48, %v2923_v34  ;;  %v2660_v6 = vld [vmem:[#allocation5 + $0x198] sm:$0xff]   ;;  %v2662_v8 = vld [vmem:[#allocation5 + $0x110] sm:$0xff]   ;;  %v2666_v12 = vld [vmem:[#allocation5 + $0x108] sm:$0xff]  }
  0x39   :  { %2380 = vmatpush3.bf16.msra.mxu1 %v2627_v19  ;;  %v2664_v10 = vld [vmem:[#allocation5 + $0x190] sm:$0xff]   ;;  %v2669_v13 = vld [vmem:[#allocation5 + $0x140] sm:$0xff]   ;;  %v2668_v14 = vld [vmem:[#allocation5 + $0x188] sm:$0xff]   ;;  %v458_v22 = vcombine.high %v442_v17, %v442_v17 }
  0x3a   :  { %2381 = vmatprep.subr.bf16.mxu1 %v2630_v25  ;;  %1671 = vmatprep.mubr.bf16.mxu1 %v459_v51  ;;  %v460_v56 = vcombine.high %v456_v53, %v456_v53  ;;  %v2671_v15 = vld [vmem:[#allocation5 + $0x1c0] sm:$0xff]   ;;  %v2673_v18 = vld [vmem:[#allocation5 + $0x278] sm:$0xff]   ;;  %v2677_v23 = vld [vmem:[#allocation5 + $0x270] sm:$0xff]  }
  0x3b   :  { %2360 = vmatpush3.bf16.msra.mxu0 %v2629_v24  ;;  %v2670_v16 = vld [vmem:[#allocation5 + $0x100] sm:$0xff]   ;;  %v2675_v20 = vld [vmem:[#allocation5 + $0x2f8] sm:$0xff]   ;;  %v2679_v25 = vld [vmem:[#allocation5 + $0x2f0] sm:$0xff]  }
  0x3c   :  { %2361 = vmatprep.subr.bf16.mxu0 %v2632_v27  ;;  %v2672_v19 = vld [vmem:[#allocation5 + $0x180] sm:$0xff]   ;;  %v2674_v21 = vld [vmem:[#allocation5 + $0x238] sm:$0xff]   ;;  %v2681_v27 = vld [vmem:[#allocation5 + $0x268] sm:$0xff]  }
  0x3d   :  { %2382 = vmatpush3.bf16.msra.mxu1 %v2631_v26  ;;  %v2676_v24 = vld [vmem:[#allocation5 + $0x2b8] sm:$0xff]   ;;  %v2678_v26 = vld [vmem:[#allocation5 + $0x230] sm:$0xff]   ;;  %v2683_v29 = vld [vmem:[#allocation5 + $0x2e8] sm:$0xff]  }
  0x3e   :  { %2383 = vmatprep.subr.bf16.mxu1 %v2634_v31  ;;  %v2680_v28 = vld [vmem:[#allocation5 + $0x2b0] sm:$0xff]   ;;  %v2685_v31 = vld [vmem:[#allocation5 + $0x260] sm:$0xff]   ;;  %v2691_v38 = vld [vmem:[#allocation5 + $0x2d8] sm:$0xff]  }
  0x3f   :  { %2362 = vmatpush3.bf16.msra.mxu0 %v2633_v30  ;;  %v2682_v30 = vld [vmem:[#allocation5 + $0x228] sm:$0xff]   ;;  %v2688_v37 = vld [vmem:[#allocation5 + $0x2a0] sm:$0xff]   ;;  %v2690_v39 = vld [vmem:[#allocation5 + $0x218] sm:$0xff]  }
  0x40   :  { %2363 = vmatprep.subr.bf16.mxu0 %v2636_v33  ;;  %v2687_v33 = vld [vmem:[#allocation5 + $0x2e0] sm:$0xff]   ;;  %v2695_v42 = vld [vmem:[#allocation5 + $0x2d0] sm:$0xff]   ;;  %v2697_v44 = vld [vmem:[#allocation5 + $0x248] sm:$0xff]  }
  0x41   :  { %2384 = vmatpush3.bf16.msra.mxu1 %v2635_v32  ;;  %v2684_v32 = vld [vmem:[#allocation5 + $0x2a8] sm:$0xff]   ;;  %v2701_v48 = vld [vmem:[#allocation5 + $0x240] sm:$0xff]   ;;  %v62_v51 = vld [vmem:[#allocation2 + $0x8] sm:$0xff] }
  0x42   :  { %2385 = vmatprep.subr.bf16.mxu1 %v2638_v36  ;;  %v2689_v36 = vld [vmem:[#allocation5 + $0x258] sm:$0xff]   ;;  %v2699_v46 = vld [vmem:[#allocation5 + $0x2c8] sm:$0xff]  }
  0x43   :  { %2364 = vmatpush3.bf16.msra.mxu0 %v2637_v35  ;;  %v2686_v35 = vld [vmem:[#allocation5 + $0x220] sm:$0xff]  }
  0x44   :  { %2393 = vmatprep.subr.bf16.mxu0 %v2641_v41  ;;  %v2692_v41 = vld [vmem:[#allocation5 + $0x298] sm:$0xff]  }
  0x45   :  { %2386 = vmatpush3.bf16.msra.mxu1 %v2640_v40  ;;  %v2693_v40 = vld [vmem:[#allocation5 + $0x250] sm:$0xff]  }
  0x46   :  { %2415 = vmatprep.subr.bf16.mxu1 %v2643_v45  ;;  %1632 = vmatmul.mubr.bf16.vlgmr.msra.gmra.mxu0 %v435_v43  ;;  %v2694_v43 = vld [vmem:[#allocation5 + $0x210] sm:$0xff]  }
  0x47   :  { %2394 = vmatpush3.bf16.msra.mxu0 %v2642_v47  ;;  %1711 = vmatprep.mubr.bf16.mxu0 %v456_v53  ;;  %v2696_v45 = vld [vmem:[#allocation5 + $0x290] sm:$0xff]   ;;  %v2698_v47 = vld [vmem:[#allocation5 + $0x208] sm:$0xff]   ;;  %v468_v53 = vrot.slane %v62_v51, %v2923_v34 }
  0x48   :  { %1672 = vmatmul.mubr.bf16.vlgmr.msra.gmra.mxu1 %v457_v49  ;;  %2395 = vmatprep.subr.bf16.mxu0 %v2645_v50  ;;  %v2700_v49 = vld [vmem:[#allocation5 + $0x288] sm:$0xff]   ;;  %v2703_v50 = vld [vmem:[#allocation5 + $0x2c0] sm:$0xff]  }
  0x49   :  { %2416 = vmatpush3.bf16.msra.mxu1 %v2644_v52  ;;  %1751 = vmatprep.mubr.bf16.mxu1 %v460_v56  ;;  %v2702_v52 = vld [vmem:[#allocation5 + $0x200] sm:$0xff]   ;;  %v476_v56 = vcombine.high %v468_v53, %v468_v53 }
  0x4a   :  { %2417 = vmatprep.subr.bf16.mxu1 %v2647_v54  ;;  %v461_v54 = vcombine.high %v62_v51, %v62_v51  ;;  %v2754_v51 = vld [vmem:[#allocation5 + $0x458] sm:$0xff]  }
  0x4b   :  { %2396 = vmatpush3.bf16.msra.mxu0 %v2646_v55  ;;  %v2705_v55 = vld [vmem:[#allocation5 + $0x378] sm:$0xff]  }
  0x4c   :  { %2397 = vmatprep.subr.bf16.mxu0 %v2649_v57  ;;  %v2704_v57 = vld [vmem:[#allocation5 + $0x280] sm:$0xff]  }
  0x4d   :  { %2418 = vmatpush3.bf16.msra.mxu1 %v2648_v58  ;;  %v484_v58 = vrot.slane %v468_v53, %v2923_v34  ;;  %v2756_v53 = vld [vmem:[#allocation5 + $0x4d8] sm:$0xff]  }
  0x4e   :  { %2419 = vmatprep.subr.bf16.mxu1 %v2651_v59  ;;  %v2939_v59 = vrot.slane %v461_v54, %v2923_v34  ;;  %v2755_v54 = vld [vmem:[#allocation5 + $0x418] sm:$0xff]  }
  0x4f   :  { %2398 = vmatpush3.bf16.msra.mxu0 %v2650_v60  ;;  %v2707_v60 = vld [vmem:[#allocation5 + $0x3f8] sm:$0xff]  }
  0x50   :  { %2399 = vmatprep.subr.bf16.mxu0 %v2653_v61  ;;  %v498_v61 = vrot.slane %v476_v56, %v2923_v34  ;;  %v2757_v56 = vld [vmem:[#allocation5 + $0x498] sm:$0xff]  }
  0x51   :  { %2420 = vmatpush3.bf16.msra.mxu1 %v2652_v62  ;;  %v2706_v62 = vld [vmem:[#allocation5 + $0x338] sm:$0xff]  }
  0x52   :  { %2421 = vmatprep.subr.bf16.mxu1 %v2655_v63  ;;  %v477_v63 = vcombine.high %v2939_v59, %v2939_v59 }
  0x53   :  { %2400 = vmatpush3.bf16.msra.mxu0 %v2654_v0  ;;  %v506_v0 = vcombine.high %v484_v58, %v484_v58 }
  0x54   :  { %2401 = vmatprep.subr.bf16.mxu0 %v2657_v1  ;;  %v2709_v1 = vld [vmem:[#allocation5 + $0x370] sm:$0xff]  }
  0x55   :  { %2422 = vmatpush3.bf16.msra.mxu1 %v2656_v2  ;;  %v508_v2 = vcombine.high %v498_v61, %v498_v61 }
  0x56   :  { %2423 = vmatprep.subr.bf16.mxu1 %v2659_v3  ;;  %v2708_v3 = vld [vmem:[#allocation5 + $0x3b8] sm:$0xff]  }
  0x57   :  { %2402 = vmatpush3.bf16.msra.mxu0 %v2658_v4  ;;  %v505_v4 = vrot.slane %v477_v63, %v2923_v34  ;;  %v2766_v63 = vld [vmem:[#allocation5 + $0x440] sm:$0xff]  }
  0x58   :  { %2403 = vmatprep.subr.bf16.mxu0 %v2661_v5  ;;  %v2711_v5 = vld [vmem:[#allocation5 + $0x3f0] sm:$0xff]  }
  0x59   :  { %2424 = vmatpush3.bf16.msra.mxu1 %v2660_v6  ;;  %v2710_v6 = vld [vmem:[#allocation5 + $0x330] sm:$0xff]  }
  0x5a   :  { %2425 = vmatprep.subr.bf16.mxu1 %v2663_v7  ;;  %v509_v7 = vcombine.high %v505_v4, %v505_v4 }
  0x5b   :  { %2404 = vmatpush3.bf16.msra.mxu0 %v2662_v8  ;;  %v2713_v8 = vld [vmem:[#allocation5 + $0x368] sm:$0xff]  }
  0x5c   :  { %2405 = vmatprep.subr.bf16.mxu0 %v2665_v9  ;;  %v2712_v9 = vld [vmem:[#allocation5 + $0x3b0] sm:$0xff]  }
  0x5d   :  { %2426 = vmatpush3.bf16.msra.mxu1 %v2664_v10  ;;  %v2715_v10 = vld [vmem:[#allocation5 + $0x3e8] sm:$0xff]  }
  0x5e   :  { %2427 = vmatprep.subr.bf16.mxu1 %v2667_v11  ;;  %v2714_v11 = vld [vmem:[#allocation5 + $0x328] sm:$0xff]  }
  0x5f   :  { %2406 = vmatpush3.bf16.msra.mxu0 %v2666_v12  ;;  %v2717_v12 = vld [vmem:[#allocation5 + $0x360] sm:$0xff]  }
  0x60   :  { %2407 = vmatprep.subr.bf16.mxu0 %v2669_v13  ;;  %v2716_v13 = vld [vmem:[#allocation5 + $0x3a8] sm:$0xff]  }
  0x61   :  { %2428 = vmatpush3.bf16.msra.mxu1 %v2668_v14  ;;  %v2719_v14 = vld [vmem:[#allocation5 + $0x3e0] sm:$0xff]  }
  0x62   :  { %2429 = vmatprep.subr.bf16.mxu1 %v2671_v15  ;;  %v2718_v15 = vld [vmem:[#allocation5 + $0x320] sm:$0xff]  }
  0x63   :  { %2408 = vmatpush3.bf16.msra.mxu0 %v2670_v16  ;;  %v2721_v16 = vld [vmem:[#allocation5 + $0x358] sm:$0xff]  }
  0x64   :  { %2437 = vmatprep.subr.bf16.mxu0 %v2673_v18  ;;  %v2723_v18 = vld [vmem:[#allocation5 + $0x3d8] sm:$0xff]  }
  0x65   :  { %2430 = vmatpush3.bf16.msra.mxu1 %v2672_v19  ;;  %v2722_v19 = vld [vmem:[#allocation5 + $0x318] sm:$0xff]  }
  0x66   :  { %1712 = vmatmul.mubr.bf16.vlgmr.msra.gmra.mxu0 %v442_v17  ;;  %2459 = vmatprep.subr.bf16.mxu1 %v2675_v20  ;;  %v2720_v17 = vld [vmem:[#allocation5 + $0x3a0] sm:$0xff]   ;;  %v2725_v20 = vld [vmem:[#allocation5 + $0x350] sm:$0xff]  }
  0x67   :  { %2438 = vmatpush3.bf16.msra.mxu0 %v2674_v21  ;;  %1791 = vmatprep.mubr.bf16.mxu0 %v498_v61  ;;  %v2724_v21 = vld [vmem:[#allocation5 + $0x398] sm:$0xff]   ;;  %v2764_v61 = vld [vmem:[#allocation5 + $0x4c8] sm:$0xff]  }
  0x68   :  { %1752 = vmatmul.mubr.bf16.vlgmr.msra.gmra.mxu1 %v458_v22  ;;  %2439 = vmatprep.subr.bf16.mxu0 %v2677_v23  ;;  %v2727_v22 = vld [vmem:[#allocation5 + $0x3d0] sm:$0xff]  }
  0x69   :  { %2460 = vmatpush3.bf16.msra.mxu1 %v2676_v24  ;;  %1831 = vmatprep.mubr.bf16.mxu1 %v508_v2  ;;  %v2726_v23 = vld [vmem:[#allocation5 + $0x310] sm:$0xff]   ;;  %v2729_v24 = vld [vmem:[#allocation5 + $0x348] sm:$0xff]   ;;  %v63_v2 = vld [vmem:[#allocation2 + $0x10] sm:$0x3f] }
  0x6a   :  { %2461 = vmatprep.subr.bf16.mxu1 %v2679_v25  ;;  %v2728_v25 = vld [vmem:[#allocation5 + $0x390] sm:$0xff]  }
  0x6b   :  { %2440 = vmatpush3.bf16.msra.mxu0 %v2678_v26  ;;  %v2731_v26 = vld [vmem:[#allocation5 + $0x3c8] sm:$0xff]  }
  0x6c   :  { %2441 = vmatprep.subr.bf16.mxu0 %v2681_v27  ;;  %v2730_v27 = vld [vmem:[#allocation5 + $0x308] sm:$0xff]  }
  0x6d   :  { %2462 = vmatpush3.bf16.msra.mxu1 %v2680_v28  ;;  %v2733_v28 = vld [vmem:[#allocation5 + $0x340] sm:$0xff]  }
  0x6e   :  { %2463 = vmatprep.subr.bf16.mxu1 %v2683_v29  ;;  %v2732_v29 = vld [vmem:[#allocation5 + $0x388] sm:$0xff]  }
  0x6f   :  { %2442 = vmatpush3.bf16.msra.mxu0 %v2682_v30  ;;  %v2735_v30 = vld [vmem:[#allocation5 + $0x3c0] sm:$0xff]  }
  0x70   :  { %2443 = vmatprep.subr.bf16.mxu0 %v2685_v31  ;;  %v2734_v31 = vld [vmem:[#allocation5 + $0x300] sm:$0xff]  }
  0x71   :  { %2464 = vmatpush3.bf16.msra.mxu1 %v2684_v32  ;;  %v491_v32 = vrot.slane %v2939_v59, %v2923_v34  ;;  %v2762_v59 = vld [vmem:[#allocation5 + $0x448] sm:$0xff]  }
  0x72   :  { %2465 = vmatprep.subr.bf16.mxu1 %v2687_v33  ;;  %v2738_v33 = vld [vmem:[#allocation5 + $0x478] sm:$0xff]  }
  0x73   :  { %2444 = vmatpush3.bf16.msra.mxu0 %v2686_v35  ;;  %v2737_v35 = vld [vmem:[#allocation5 + $0x380] sm:$0xff]  }
  0x74   :  { %2445 = vmatprep.subr.bf16.mxu0 %v2689_v36  ;;  %v2740_v36 = vld [vmem:[#allocation5 + $0x4f8] sm:$0xff]  }
  0x75   :  { %2466 = vmatpush3.bf16.msra.mxu1 %v2688_v37  ;;  %v2739_v37 = vld [vmem:[#allocation5 + $0x438] sm:$0xff]  }
  0x76   :  { %2467 = vmatprep.subr.bf16.mxu1 %v2691_v38  ;;  %v507_v38 = vcombine.high %v491_v32, %v491_v32 }
  0x77   :  { %2446 = vmatpush3.bf16.msra.mxu0 %v2690_v39  ;;  %v2742_v39 = vld [vmem:[#allocation5 + $0x470] sm:$0xff]  }
  0x78   :  { %2447 = vmatprep.subr.bf16.mxu0 %v2693_v40  ;;  %v2741_v40 = vld [vmem:[#allocation5 + $0x4b8] sm:$0xff]  }
  0x79   :  { %2468 = vmatpush3.bf16.msra.mxu1 %v2692_v41  ;;  %v2744_v41 = vld [vmem:[#allocation5 + $0x4f0] sm:$0xff]  }
  0x7a   :  { %2469 = vmatprep.subr.bf16.mxu1 %v2695_v42  ;;  %v2743_v42 = vld [vmem:[#allocation5 + $0x430] sm:$0xff]  }
  0x7b   :  { %2448 = vmatpush3.bf16.msra.mxu0 %v2694_v43  ;;  %v2746_v43 = vld [vmem:[#allocation5 + $0x468] sm:$0xff]  }
  0x7c   :  { %2449 = vmatprep.subr.bf16.mxu0 %v2697_v44  ;;  %v2745_v44 = vld [vmem:[#allocation5 + $0x4b0] sm:$0xff]  }
  0x7d   :  { %2470 = vmatpush3.bf16.msra.mxu1 %v2696_v45  ;;  %v2748_v45 = vld [vmem:[#allocation5 + $0x4e8] sm:$0xff]  }
  0x7e   :  { %2471 = vmatprep.subr.bf16.mxu1 %v2699_v46  ;;  %v2747_v46 = vld [vmem:[#allocation5 + $0x428] sm:$0xff]  }
  0x7f   :  { %2450 = vmatpush3.bf16.msra.mxu0 %v2698_v47  ;;  %v2750_v47 = vld [vmem:[#allocation5 + $0x460] sm:$0xff]  }
  0x80   :  { %2451 = vmatprep.subr.bf16.mxu0 %v2701_v48  ;;  %v2749_v48 = vld [vmem:[#allocation5 + $0x4a8] sm:$0xff]  }
  0x81   :  { %2472 = vmatpush3.bf16.msra.mxu1 %v2700_v49  ;;  %v2752_v49 = vld [vmem:[#allocation5 + $0x4e0] sm:$0xff]  }
  0x82   :  { %2473 = vmatprep.subr.bf16.mxu1 %v2703_v50  ;;  %v2751_v50 = vld [vmem:[#allocation5 + $0x420] sm:$0xff]  }
  0x83   :  { %2452 = vmatpush3.bf16.msra.mxu0 %v2702_v52  ;;  %v2753_v52 = vld [vmem:[#allocation5 + $0x4a0] sm:$0xff]  }
  0x84   :  { %2481 = vmatprep.subr.bf16.mxu0 %v2705_v55  ;;  %v2758_v55 = vld [vmem:[#allocation5 + $0x450] sm:$0xff]  }
  0x85   :  { %2474 = vmatpush3.bf16.msra.mxu1 %v2704_v57  ;;  %v2760_v57 = vld [vmem:[#allocation5 + $0x4d0] sm:$0xff]  }
  0x86   :  { %1792 = vmatmul.mubr.bf16.vlgmr.msra.gmra.mxu0 %v484_v58  ;;  %2503 = vmatprep.subr.bf16.mxu1 %v2707_v60  ;;  %v2759_v58 = vld [vmem:[#allocation5 + $0x410] sm:$0xff]  }
  0x87   :  { %2482 = vmatpush3.bf16.msra.mxu0 %v2706_v62  ;;  %1871 = vmatprep.mubr.bf16.mxu0 %v505_v4  ;;  %v2761_v60 = vld [vmem:[#allocation5 + $0x490] sm:$0xff]   ;;  %v2763_v62 = vld [vmem:[#allocation5 + $0x408] sm:$0xff]   ;;  %v510_v4 = vcombine.high %v63_v2, %v63_v2 }
  0x88   :  { %1832 = vmatmul.mubr.bf16.vlgmr.msra.gmra.mxu1 %v506_v0  ;;  %2483 = vmatprep.subr.bf16.mxu0 %v2709_v1  ;;  %v2765_v0 = vld [vmem:[#allocation5 + $0x488] sm:$0xff]   ;;  %v2768_v1 = vld [vmem:[#allocation5 + $0x4c0] sm:$0xff]  }
  0x89   :  { %2504 = vmatpush3.bf16.msra.mxu1 %v2708_v3  ;;  %1911 = vmatprep.mubr.bf16.mxu1 %v509_v7  ;;  %v2767_v3 = vld [vmem:[#allocation5 + $0x400] sm:$0xff]  }
  0x8a   :  { %2505 = vmatprep.subr.bf16.mxu1 %v2711_v5  ;;  %v517_v5 = vrot.slane %v63_v2, %v2923_v34  ;;  %v2770_v7 = vld [vmem:[#allocation5 + $0x480] sm:$0xff]  }
  0x8b   :  { %2484 = vmatpush3.bf16.msra.mxu0 %v2710_v6 }
  0x8c   :  { %2485 = vmatprep.subr.bf16.mxu0 %v2713_v8  ;;  %v525_v6 = vcombine.high %v517_v5, %v517_v5  ;;  %v533_v8 = vrot.slane %v517_v5, %v2923_v34 }
  0x8d   :  { %2506 = vmatpush3.bf16.msra.mxu1 %v2712_v9  ;;  %v524_v9 = vrot.slane %v510_v4, %v2923_v34 }
  0x8e   :  { %2507 = vmatprep.subr.bf16.mxu1 %v2715_v10  ;;  %v547_v10 = vrot.slane %v525_v6, %v2923_v34 }
  0x8f   :  { %2486 = vmatpush3.bf16.msra.mxu0 %v2714_v11  ;;  %v2771_v11 = vld [vmem:[#allocation5 + $0x538] sm:$0xff]  }
  0x90   :  { %2487 = vmatprep.subr.bf16.mxu0 %v2717_v12  ;;  %v526_v12 = vcombine.high %v524_v9, %v524_v9 }
  0x91   :  { %2508 = vmatpush3.bf16.msra.mxu1 %v2716_v13  ;;  %v2880_v13 = vmov 0  }
  0x92   :  { %2509 = vmatprep.subr.bf16.mxu1 %v2719_v14  ;;  %v555_v14 = vcombine.high %v533_v8, %v533_v8 }
  0x93   :  { %2488 = vmatpush3.bf16.msra.mxu0 %v2718_v15  ;;  %v556_v15 = vcombine.high %v547_v10, %v547_v10 }
  0x94   :  { %2489 = vmatprep.subr.bf16.mxu0 %v2721_v16  ;;  %v554_v16 = vrot.slane %v526_v12, %v2923_v34 }
  0x95   :  { %2510 = vmatpush3.bf16.msra.mxu1 %v2720_v17  ;;  %v2772_v17 = vld [vmem:[#allocation5 + $0x530] sm:$0xff]  }
  0x96   :  { %2511 = vmatprep.subr.bf16.mxu1 %v2723_v18  ;;  %v2773_v18 = vld [vmem:[#allocation5 + $0x528] sm:$0xff]  }
  0x97   :  { %2490 = vmatpush3.bf16.msra.mxu0 %v2722_v19  ;;  %v2774_v19 = vld [vmem:[#allocation5 + $0x520] sm:$0xff]  }
  0x98   :  { %2491 = vmatprep.subr.bf16.mxu0 %v2725_v20  ;;  %v2775_v20 = vld [vmem:[#allocation5 + $0x518] sm:$0xff]  }
  0x99   :  { %2512 = vmatpush3.bf16.msra.mxu1 %v2724_v21  ;;  %v2776_v21 = vld [vmem:[#allocation5 + $0x510] sm:$0xff]  }
  0x9a   :  { %2513 = vmatprep.subr.bf16.mxu1 %v2727_v22  ;;  %v2777_v22 = vld [vmem:[#allocation5 + $0x508] sm:$0xff]  }
  0x9b   :  { %2492 = vmatpush3.bf16.msra.mxu0 %v2726_v23  ;;  %v2778_v23 = vld [vmem:[#allocation5 + $0x500] sm:$0xff]  }
  0x9c   :  { %2493 = vmatprep.subr.bf16.mxu0 %v2729_v24  ;;  %v2779_v24 = vld [vmem:[#allocation5 + $0x540] sm:$0x3f]  }
  0x9d   :  { %2514 = vmatpush3.bf16.msra.mxu1 %v2728_v25  ;;  %v1597_v25 = vsel %vm1595_vm1, %v2779_v24, 0 }
  0x9e   :  { %2515 = vmatprep.subr.bf16.mxu1 %v2731_v26  ;;  %v540_v26 = vrot.slane %v524_v9, %v2923_v34 }
  0x9f   :  { %2494 = vmatpush3.bf16.msra.mxu0 %v2730_v27 }
  0xa0   :  { %2495 = vmatprep.subr.bf16.mxu0 %v2733_v28  ;;  %v2169_v28 = vld [vmem:[%s2964_s2] ss:$0 sm:$0xff] }
  0xa1   :  { %2516 = vmatpush3.bf16.msra.mxu1 %v2732_v29 }
  0xa2   :  { %2517 = vmatprep.subr.bf16.mxu1 %v2735_v30 }
  0xa3   :  { %2496 = vmatpush3.bf16.msra.mxu0 %v2734_v31 }
  0xa4   :  { %2525 = vmatprep.subr.bf16.mxu0 %v2738_v33 }
  0xa5   :  { %2518 = vmatpush3.bf16.msra.mxu1 %v2737_v35 }
  0xa6   :  { %1872 = vmatmul.mubr.bf16.vlgmr.msra.gmra.mxu0 %v491_v32  ;;  %2547 = vmatprep.subr.bf16.mxu1 %v2740_v36 }
  0xa7   :  { %2526 = vmatpush3.bf16.msra.mxu0 %v2739_v37  ;;  %1951 = vmatprep.mubr.bf16.mxu0 %v547_v10 }
  0xa8   :  { %1912 = vmatmul.mubr.bf16.vlgmr.msra.gmra.mxu1 %v507_v38  ;;  %2527 = vmatprep.subr.bf16.mxu0 %v2742_v39  ;;  %v2780_v39 = vld [vmem:[#allocation7 + $0x38] sm:$0xff]  }
  0xa9   :  { %2548 = vmatpush3.bf16.msra.mxu1 %v2741_v40  ;;  %1991 = vmatprep.mubr.bf16.mxu1 %v556_v15 }
  0xaa   :  { %2549 = vmatprep.subr.bf16.mxu1 %v2744_v41  ;;  %v2881_v41 = vmov 0.0  }
  0xab   :  { %2528 = vmatpush3.bf16.msra.mxu0 %v2743_v42  ;;  %v2781_v42 = vld [vmem:[#allocation7 + $0x30] sm:$0xff]  }
  0xac   :  { %2529 = vmatprep.subr.bf16.mxu0 %v2746_v43  ;;  %v2782_v43 = vld [vmem:[#allocation7 + $0x28] sm:$0xff]  }
  0xad   :  { %2550 = vmatpush3.bf16.msra.mxu1 %v2745_v44  ;;  %v2783_v44 = vld [vmem:[#allocation7 + $0x20] sm:$0xff]  }
  0xae   :  { %2551 = vmatprep.subr.bf16.mxu1 %v2748_v45  ;;  %v2784_v45 = vld [vmem:[#allocation7 + $0x18] sm:$0xff]  }
  0xaf   :  { %2530 = vmatpush3.bf16.msra.mxu0 %v2747_v46  ;;  %v2785_v46 = vld [vmem:[#allocation7 + $0x10] sm:$0xff]  }
  0xb0   :  { %2531 = vmatprep.subr.bf16.mxu0 %v2750_v47 }
  0xb1   :  { %2552 = vmatpush3.bf16.msra.mxu1 %v2749_v48 }
  0xb2   :  { %2553 = vmatprep.subr.bf16.mxu1 %v2752_v49 }
  0xb3   :  { %2532 = vmatpush3.bf16.msra.mxu0 %v2751_v50  ;;  %v2786_v50 = vld [vmem:[#allocation7 + $0x8] sm:$0xff]  }
  0xb4   :  { %2533 = vmatprep.subr.bf16.mxu0 %v2754_v51 }
  0xb5   :  { %2554 = vmatpush3.bf16.msra.mxu1 %v2753_v52 }
  0xb6   :  { %2555 = vmatprep.subr.bf16.mxu1 %v2756_v53 }
  0xb7   :  { %2534 = vmatpush3.bf16.msra.mxu0 %v2755_v54 }
  0xb8   :  { %2535 = vmatprep.subr.bf16.mxu0 %v2758_v55 }
  0xb9   :  { %2556 = vmatpush3.bf16.msra.mxu1 %v2757_v56 }
  0xba   :  { %2557 = vmatprep.subr.bf16.mxu1 %v2760_v57 }
  0xbb   :  { %2536 = vmatpush3.bf16.msra.mxu0 %v2759_v58  ;;  %v2787_v58 = vld [vmem:[#allocation7] sm:$0xff]  }
  0xbc   :  { %2537 = vmatprep.subr.bf16.mxu0 %v2762_v59 }
  0xbd   :  { %2558 = vmatpush3.bf16.msra.mxu1 %v2761_v60 }
  0xbe   :  { %2559 = vmatprep.subr.bf16.mxu1 %v2764_v61 }
  0xbf   :  { %2538 = vmatpush3.bf16.msra.mxu0 %v2763_v62 }
  0xc0   :  { %2539 = vmatprep.subr.bf16.mxu0 %v2766_v63 }
  0xc1   :  { %2560 = vmatpush3.bf16.msra.mxu1 %v2765_v0 }
  0xc2   :  { %2561 = vmatprep.subr.bf16.mxu1 %v2768_v1 }
  0xc3   :  { %2540 = vmatpush3.bf16.msra.mxu0 %v2767_v3 }
  0xc4   :  { %1999 = vmatprep.subr.bf16.mxu0 %v2880_v13 }
  0xc5   :  { %2562 = vmatpush3.bf16.msra.mxu1 %v2770_v7 }
  0xc6   :  { %1952 = vmatmul.mubr.bf16.vlgmr.msra.gmra.mxu0 %v533_v8  ;;  %2578 = vmatprep.subr.bf16.mxu1 %v2881_v41 }
  0xc7   :  { %2000 = vmatpush1.bf16.msra.mxu0 %v2771_v11  ;;  %2339 = vmatprep.mubr.msk.bf16.mxu0 %vm1591_vm0, %v554_v16 }
  0xc8   :  { %1992 = vmatmul.mubr.bf16.vlgmr.msra.gmra.mxu1 %v555_v14  ;;  %2001 = vmatprep.subr.bf16.mxu0 %v2880_v13 }
  0xc9   :  { %2579 = vmatpush3.bf16.msra.mxu1 %v2780_v39  ;;  %2594 = vmatprep.mubr.msk.bf16.mxu1 %vm2882_vm2, %v2881_v41 }
  0xca   :  { %2580 = vmatprep.subr.bf16.mxu1 %v2881_v41 }
  0xcb   :  { %2002 = vmatpush1.bf16.msra.mxu0 %v2772_v17 }
  0xcc   :  { %2003 = vmatprep.subr.bf16.mxu0 %v2880_v13 }
  0xcd   :  { %2581 = vmatpush3.bf16.msra.mxu1 %v2781_v42 }
  0xce   :  { %2582 = vmatprep.subr.bf16.mxu1 %v2881_v41 }
  0xcf   :  { %2004 = vmatpush1.bf16.msra.mxu0 %v2773_v18 }
  0xd0   :  { %2005 = vmatprep.subr.bf16.mxu0 %v2880_v13 }
  0xd1   :  { %2583 = vmatpush3.bf16.msra.mxu1 %v2782_v43 }
  0xd2   :  { %2584 = vmatprep.subr.bf16.mxu1 %v2881_v41 }
  0xd3   :  { %2006 = vmatpush1.bf16.msra.mxu0 %v2774_v19 }
  0xd4   :  { %2007 = vmatprep.subr.bf16.mxu0 %v2880_v13 }
  0xd5   :  { %2585 = vmatpush3.bf16.msra.mxu1 %v2783_v44 }
  0xd6   :  { %2586 = vmatprep.subr.bf16.mxu1 %v2881_v41 }
  0xd7   :  { %2008 = vmatpush1.bf16.msra.mxu0 %v2775_v20 }
  0xd8   :  { %2009 = vmatprep.subr.bf16.mxu0 %v2880_v13 }
  0xd9   :  { %2587 = vmatpush3.bf16.msra.mxu1 %v2784_v45 }
  0xda   :  { %2588 = vmatprep.subr.bf16.mxu1 %v2881_v41 }
  0xdb   :  { %2010 = vmatpush1.bf16.msra.mxu0 %v2776_v21 }
  0xdc   :  { %2011 = vmatprep.subr.bf16.mxu0 %v2880_v13 }
  0xdd   :  { %2589 = vmatpush3.bf16.msra.mxu1 %v2785_v46 }
  0xde   :  { %2590 = vmatprep.subr.bf16.mxu1 %v2881_v41 }
  0xdf   :  { %2012 = vmatpush1.bf16.msra.mxu0 %v2777_v22 }
  0xe0   :  { %2013 = vmatprep.subr.bf16.mxu0 %v2880_v13 }
  0xe1   :  { %2591 = vmatpush3.bf16.msra.mxu1 %v2786_v50 }
  0xe2   :  { %2592 = vmatprep.subr.bf16.mxu1 %v2881_v41  ;;  %v2340_v41 = vld [vmem:[%s2966_s4] ss:$0 sm:$0xff] }
  0xe3   :  { %2014 = vmatpush1.bf16.msra.mxu0 %v2778_v23 }
  0xe4   :  { %2029 = vmatprep.subr.bf16.mxu0 %v2880_v13 }
  0xe5   :  { %2593 = vmatpush3.bf16.msra.mxu1 %v2787_v58 }
  0xe7   :  { %2030 = vmatpush2.bf16.msra.mxu0 %v1597_v25 }
  0xea   :  { %2032 = vmatmul.mubr.bf16.vlgmr.msra.gmra.mxu0 %v540_v26 }
 0x106   :  { %v2365_v27 = vpop.f32.mrf.mxu0 }
 0x108   :  { %v2366_v29 = vpop.f32.mrf.mxu0  ;;  %v2387_v30 = vpop.f32.mrf.mxu1 }
 0x109   :  { %v2367_v31 = vadd.f32 %v2366_v29, %v2365_v27 }
 0x10a   :  { %v2368_v32 = vpop.f32.mrf.mxu0  ;;  %v2388_v33 = vpop.f32.mrf.mxu1 }
 0x10b   :  { %v1634_v35 = vadd.f32 %v2367_v31, %v2169_v28  ;;  %v2389_v36 = vadd.f32 %v2388_v33, %v2387_v30 }
 0x10c   :  { %v2369_v37 = vpop.f32.mrf.mxu0  ;;  %v2390_v38 = vpop.f32.mrf.mxu1 }
 0x10d   :  { %v1674_v40 = vadd.f32 %v2389_v36, %v1634_v35 }
 0x10e   :  { %v2391_v34 = vpop.f32.mrf.mxu1 }
 0x126   :  { %v2409_v47 = vpop.f32.mrf.mxu0 }
 0x128   :  { %v2410_v48 = vpop.f32.mrf.mxu0  ;;  %v2431_v49 = vpop.f32.mrf.mxu1 }
 0x129   :  { %v2411_v51 = vadd.f32 %v2410_v48, %v2409_v47 }
 0x12a   :  { %v2412_v52 = vpop.f32.mrf.mxu0  ;;  %v2432_v53 = vpop.f32.mrf.mxu1 }
 0x12b   :  { %v1714_v54 = vadd.f32 %v2411_v51, %v1674_v40  ;;  %v2433_v55 = vadd.f32 %v2432_v53, %v2431_v49 }
 0x12c   :  { %v2413_v56 = vpop.f32.mrf.mxu0  ;;  %v2434_v57 = vpop.f32.mrf.mxu1 }
 0x12d   :  { %v1754_v59 = vadd.f32 %v2433_v55, %v1714_v54 }
 0x12e   :  { %v2435_v60 = vpop.f32.mrf.mxu1 }
 0x146   :  { %v2453_v61 = vpop.f32.mrf.mxu0 }
 0x148   :  { %v2454_v62 = vpop.f32.mrf.mxu0  ;;  %v2475_v63 = vpop.f32.mrf.mxu1 }
 0x149   :  { %v2455_v0 = vadd.f32 %v2454_v62, %v2453_v61 }
 0x14a   :  { %v2456_v1 = vpop.f32.mrf.mxu0  ;;  %v2476_v2 = vpop.f32.mrf.mxu1 }
 0x14b   :  { %v1794_v3 = vadd.f32 %v2455_v0, %v1754_v59  ;;  %v2477_v4 = vadd.f32 %v2476_v2, %v2475_v63 }
 0x14c   :  { %v2457_v5 = vpop.f32.mrf.mxu0  ;;  %v2478_v6 = vpop.f32.mrf.mxu1 }
 0x14d   :  { %v1834_v7 = vadd.f32 %v2477_v4, %v1794_v3 }
 0x14e   :  { %v2479_v8 = vpop.f32.mrf.mxu1 }
 0x166   :  { %v2497_v9 = vpop.f32.mrf.mxu0 }
 0x168   :  { %v2498_v10 = vpop.f32.mrf.mxu0  ;;  %v2519_v11 = vpop.f32.mrf.mxu1 }
 0x169   :  { %v2499_v25 = vadd.f32 %v2498_v10, %v2497_v9 }
 0x16a   :  { %v2500_v12 = vpop.f32.mrf.mxu0  ;;  %v2520_v13 = vpop.f32.mrf.mxu1 }
 0x16b   :  { %v1874_v26 = vadd.f32 %v2499_v25, %v1834_v7  ;;  %v2521_v27 = vadd.f32 %v2520_v13, %v2519_v11 }
 0x16c   :  { %v2501_v14 = vpop.f32.mrf.mxu0  ;;  %v2522_v15 = vpop.f32.mrf.mxu1 }
 0x16d   :  { %v1914_v29 = vadd.f32 %v2521_v27, %v1874_v26 }
 0x16e   :  { %v2523_v16 = vpop.f32.mrf.mxu1 }
 0x186   :  { %v2541_v17 = vpop.f32.mrf.mxu0 }
 0x188   :  { %v2542_v18 = vpop.f32.mrf.mxu0  ;;  %v2563_v19 = vpop.f32.mrf.mxu1 }
 0x189   :  { %v2543_v28 = vadd.f32 %v2542_v18, %v2541_v17 }
 0x18a   :  { %v2544_v20 = vpop.f32.mrf.mxu0  ;;  %v2564_v21 = vpop.f32.mrf.mxu1 }
 0x18b   :  { %v1954_v30 = vadd.f32 %v2543_v28, %v1914_v29  ;;  %v2565_v31 = vadd.f32 %v2564_v21, %v2563_v19 }
 0x18c   :  { %v2545_v22 = vpop.f32.mrf.mxu0  ;;  %v2566_v23 = vpop.f32.mrf.mxu1 }
 0x18d   :  { %v1994_v32 = vadd.f32 %v2565_v31, %v1954_v30 }
 0x18e   :  { %v2567_v24 = vpop.f32.mrf.mxu1 }
 0x1aa   :  { %v2033_v33 = vpop.f32.mrf.mxu0 }
 0x1ab   :  { %v2034_v35 = vadd.f32 %v2033_v33, %v1994_v32 }
 0x1ac   :  { %v2035_v36 = vpop.f32.mrf.mxu0 }
 0x1ad   :  { %v2039_v37 = vmax.f32 %v2034_v35, 0.0 }
 0x1ae   :  { %v2036_v38 = vpop.f32.mrf.mxu0 }
 0x1af   :  { %v2040_v39 = vpack.c.bf16 %v2039_v37, %v2039_v37 }
 0x1b0   :  { %v2037_v40 = vpop.f32.mrf.mxu0 }
 0x1b1   :  { %2595 = vmatmul.mubr.bf16.vlgmr.msra.gmra.mxu1 %v2040_v39 }
 0x271   :  { %v2146_v34 = vpop.f32.mrf.mxu1 }
 0x272   :  { %v2147_v42 = vadd.f32 %v2340_v41, %v2146_v34 }
 0x273   :  { %v2596_v43 = vpop.f32.mrf.mxu1 }
 0x274   :  { %2152 = vst [vmem:[#allocation8] sm:$0x3] %v2147_v42 }
 0x275   :  { %v2149_v44 = vpop.f32.mrf.mxu1 }
 0x276   :  { %2859 = shalt.err (!%p2856_p5)
}
 0x277   :  { %2162 = dma.vmem_to_hbm [thread:$0]  %s2160_s11, 32, %s2967_s5, [#allocation4]   ;;  %v2597_v45 = vpop.f32.mrf.mxu1 }
 0x278   :  { %2872 = dma.done.wait [#allocation4], 32  }
 0x279   :  { %2873 = vsyncadd [#allocation4], 4294967264 }
 0x27a   :  { %2166 = vsyncpa [#allocation3], 1 }
 0x27b   :  { %2167 = vsyncpa [#allocation6], 1 }
 0x27c   :  { %2168 = vsyncpa [#allocation4], 1 }

</bundles_post_ra>
